<compile_context>
chip_gen: v5e
topology: v5e:2x2
jax: 0.10.0
libtpu: 0.0.40
codegen_flags: <defaults>
</compile_context>

<pallas_src>
import functools
import math

import jax
import jax.numpy as jnp
from jax import lax
from jax.experimental import pallas as pl
from jax.experimental.pallas import tpu as pltpu

_VMEM_LIMIT = 32 * 1024 * 1024   # explicit scoped-VMEM budget, safe on v5e/v6e/v7x
_NEG_INF = -1e30                 # finite "minus infinity": no NaN if a row were fully masked


def _qkv_proj_kernel(x_ref, w_ref, b_ref, q_ref, k_ref, v_ref, *, scale):
    """QKV projection for one (batch, query-tile) block."""
    C = x_ref.shape[2]
    x = x_ref[0].astype(w_ref.dtype)                                      # (TQ, C) bf16
    qkv = jnp.dot(x, w_ref[...], preferred_element_type=jnp.float32)      # (TQ, 3C) f32
    qkv = qkv + b_ref[...]
    # Fold the attention scale into Q here (cheapest place to apply it).
    q_ref[0, :, :] = (qkv[:, :C] * scale).astype(q_ref.dtype)
    k_ref[0, :, :] = qkv[:, C:2 * C].astype(k_ref.dtype)
    v_ref[0, :, :] = qkv[:, 2 * C:3 * C].astype(v_ref.dtype)


def _flash_attn_proj_kernel(q_ref, k_ref, v_ref, wp_ref, bp_ref, o_ref,
                            m_ref, l_ref, acc_ref, y_ref,
                            *, tq, tk, n_head, d_head):
    """Online-softmax (flash) attention over KV tiles + fused output projection."""
    qi = pl.program_id(1)
    H, D = n_head, d_head
    qb = q_ref[0]                                   # (H, TQ, D) bf16, pre-scaled

    m_ref[...] = jnp.full(m_ref.shape, _NEG_INF, dtype=jnp.float32)
    l_ref[...] = jnp.zeros(l_ref.shape, dtype=jnp.float32)
    acc_ref[...] = jnp.zeros(acc_ref.shape, dtype=jnp.float32)

    # Causal block skipping: KV tiles strictly in the future are never loaded
    # nor computed (tk == tq, so reachable kv-tile indices are 0..qi).
    num_kv = qi + 1

    @pl.loop(0, num_kv)
    def _(s):
        start = pl.multiple_of(s * tk, tk)
        kb = k_ref[0, :, pl.ds(start, tk), :]       # (H, TK, D) bf16
        vb = v_ref[0, :, pl.ds(start, tk), :]       # (H, TK, D) bf16

        # Contract on the last dim of both operands (MXU-native): no K transpose.
        sc = jnp.einsum('hqd,hkd->hqk', qb, kb,
                        preferred_element_type=jnp.float32)               # (H,TQ,TK) f32

        # Element-level mask is only non-trivial on the diagonal block (s == qi);
        # all surviving off-diagonal blocks are fully visible, so this is cheap
        # co-issued VPU work.
        q_pos = qi * tq + lax.broadcasted_iota(jnp.int32, (tq, tk), 0)
        k_pos = start + lax.broadcasted_iota(jnp.int32, (tq, tk), 1)
        sc = jnp.where((q_pos >= k_pos)[None, :, :], sc, _NEG_INF)

        m_prev = m_ref[...]
        m_new = jnp.maximum(m_prev, sc.max(axis=-1, keepdims=True))       # (H,TQ,1)
        alpha = jnp.exp(m_prev - m_new)
        p = jnp.exp(sc - m_new)                                           # f32 softmax math
        l_ref[...] = alpha * l_ref[...] + p.sum(axis=-1, keepdims=True)
        acc_ref[...] = alpha * acc_ref[...] + jnp.einsum(
            'hqk,hkd->hqd', p.astype(vb.dtype), vb,
            preferred_element_type=jnp.float32)                           # (H,TQ,D) f32
        m_ref[...] = m_new

    # Normalize and lay heads back out lane-contiguously into a (TQ, C) VMEM
    # scratch (no jnp.concatenate of lane slices), then fuse the output
    # projection so the HBM store is a single lane-dense (TQ, C) block.
    inv_l = pl.reciprocal(l_ref[...], approx=True)                        # EUP slot, ~free
    for h in range(H):
        y_ref[:, h * D:(h + 1) * D] = acc_ref[h] * inv_l[h]
    y = y_ref[...].astype(wp_ref.dtype)                                   # (TQ, C) bf16
    out = jnp.dot(y, wp_ref[...], preferred_element_type=jnp.float32) + bp_ref[...]
    o_ref[0, :, :] = out.astype(o_ref.dtype)


def causal_self_attention(x, w_attn, b_attn, w_proj, b_proj, n_head):
    """x: (B, T, C); w_attn: (3C, C); b_attn: (3C,); w_proj: (C, C); b_proj: (C,)."""
    B, T, C = x.shape
    assert C % n_head == 0
    D = C // n_head
    scale = 1.0 / math.sqrt(D)
    cdt = jnp.bfloat16                      # MXU operand dtype (accumulation stays f32)

    # Query/KV tile length; TQ == TK keeps causal block skipping tile-aligned.
    TQ = 128 if (T % 128 == 0) else T
    nq = T // TQ

    # PyTorch nn.Linear stores weight as (out, in); transpose once host-side so
    # the kernels do plain row-major (M,K)@(K,N) matmuls.
    wqkv = jnp.asarray(w_attn).T.astype(cdt)                    # (C, 3C)
    bqkv = jnp.asarray(b_attn).reshape(1, 3 * C).astype(jnp.float32)
    wproj = jnp.asarray(w_proj).T.astype(cdt)                   # (C, C)
    bproj = jnp.asarray(b_proj).reshape(1, C).astype(jnp.float32)

    # ---- Kernel A: QKV projection -------------------------------------------
    q, k, v = pl.pallas_call(
        functools.partial(_qkv_proj_kernel, scale=scale),
        out_shape=tuple(jax.ShapeDtypeStruct((B, T, C), cdt) for _ in range(3)),
        grid_spec=pltpu.PrefetchScalarGridSpec(
            num_scalar_prefetch=0,
            grid=(B, nq),
            in_specs=[
                pl.BlockSpec((1, TQ, C), lambda b, i: (b, i, 0)),      # x tile
                pl.BlockSpec((C, 3 * C), lambda b, i: (0, 0)),         # W_qkv^T (bf16)
                pl.BlockSpec((1, 3 * C), lambda b, i: (0, 0)),         # b_qkv
            ],
            out_specs=[pl.BlockSpec((1, TQ, C), lambda b, i: (b, i, 0))] * 3,
        ),
        compiler_params=pltpu.CompilerParams(
            dimension_semantics=("parallel", "parallel"),
            vmem_limit_bytes=_VMEM_LIMIT),
    )(x, wqkv, bqkv)

    # Layout plumbing only (no compute hoisting): head-major views so every
    # in-kernel contraction is a clean leading-batch einsum.
    qh = q.reshape(B, T, n_head, D).transpose(0, 2, 1, 3)       # (B, H, T, D)
    kh = k.reshape(B, T, n_head, D).transpose(0, 2, 1, 3)
    vh = v.reshape(B, T, n_head, D).transpose(0, 2, 1, 3)

    # ---- Kernel B: flash attention + fused output projection -----------------
    out = pl.pallas_call(
        functools.partial(_flash_attn_proj_kernel, tq=TQ, tk=TQ,
                          n_head=n_head, d_head=D),
        out_shape=jax.ShapeDtypeStruct((B, T, C), x.dtype),
        grid_spec=pltpu.PrefetchScalarGridSpec(
            num_scalar_prefetch=0,
            grid=(B, nq),
            in_specs=[
                pl.BlockSpec((1, n_head, TQ, D), lambda b, i: (b, 0, i, 0)),  # Q tile
                pl.BlockSpec((1, n_head, T, D), lambda b, i: (b, 0, 0, 0)),   # K (full seq)
                pl.BlockSpec((1, n_head, T, D), lambda b, i: (b, 0, 0, 0)),   # V (full seq)
                pl.BlockSpec((C, C), lambda b, i: (0, 0)),                    # W_proj^T (bf16)
                pl.BlockSpec((1, C), lambda b, i: (0, 0)),                    # b_proj
            ],
            out_specs=pl.BlockSpec((1, TQ, C), lambda b, i: (b, i, 0)),
            scratch_shapes=[
                pltpu.VMEM((n_head, TQ, 1), jnp.float32),   # running max
                pltpu.VMEM((n_head, TQ, 1), jnp.float32),   # running denom
                pltpu.VMEM((n_head, TQ, D), jnp.float32),   # output accumulator
                pltpu.VMEM((TQ, C), jnp.float32),           # lane-dense head merge
            ],
        ),
        compiler_params=pltpu.CompilerParams(
            dimension_semantics=("parallel", "parallel"),
            vmem_limit_bytes=_VMEM_LIMIT),
    )(qh, kh, vh, wproj, bproj)
    # TODO(synk): for very large C (e.g. GPT-2 XL) K-tile W_qkv/W_proj along a
    # grid axis instead of keeping them fully resident (v7x 64 MiB VMEM budget).
    return out


def _reference(x, w_attn, b_attn, w_proj, b_proj, n_head):
    B, T, C = x.shape
    D = C // n_head
    qkv = x @ w_attn.T + b_attn
    q, k, v = jnp.split(qkv, 3, axis=2)
    q = q.reshape(B, T, n_head, D).transpose(0, 2, 1, 3)
    k = k.reshape(B, T, n_head, D).transpose(0, 2, 1, 3)
    v = v.reshape(B, T, n_head, D).transpose(0, 2, 1, 3)
    att = (q @ jnp.swapaxes(k, -2, -1)) * (1.0 / math.sqrt(D))
    mask = jnp.tril(jnp.ones((T, T), dtype=bool))
    att = jnp.where(mask, att, -jnp.inf)
    att = jax.nn.softmax(att, axis=-1)
    y = att @ v
    y = y.transpose(0, 2, 1, 3).reshape(B, T, C)
    return y @ w_proj.T + b_proj


if __name__ == "__main__":
    # Small GPT-2-like config: B=2, block_size T=8, n_embd=32, n_head=4
    B, T, C, n_head = 2, 8, 32, 4

    key = jax.random.PRNGKey(0)
    kx, k1, k2, k3, k4 = jax.random.split(key, 5)

    x = jax.random.normal(kx, (B, T, C), dtype=jnp.float32)
    # PyTorch nn.Linear shapes: weight (out_features, in_features).
    w_attn = jax.random.normal(k1, (3 * C, C), dtype=jnp.float32) * 0.02
    b_attn = jax.random.normal(k2, (3 * C,), dtype=jnp.float32) * 0.02
    w_proj = jax.random.normal(k3, (C, C), dtype=jnp.float32) * 0.02
    b_proj = jax.random.normal(k4, (C,), dtype=jnp.float32) * 0.02

    out = causal_self_attention(x, w_attn, b_attn, w_proj, b_proj, n_head)
    out = jax.block_until_ready(out)

    ref = _reference(x, w_attn, b_attn, w_proj, b_proj, n_head)
    assert out.shape == (B, T, C)
    # Tolerance loosened vs the f32 version: bf16 MXU operands + approx reciprocal.
    assert jnp.allclose(out, ref, atol=2e-2, rtol=2e-2), "mismatch vs. reference"

    print("KERNEL_OK")
</pallas_src>

<mosaic_0001>
module attributes {stable_mosaic.version = 11 : i64} {
  func.func @_qkv_proj_kernel(%arg0: i32, %arg1: i32, %arg2: memref<1x8x32xf32, #tpu.memory_space<vmem>>, %arg3: memref<32x96xbf16, #tpu.memory_space<vmem>>, %arg4: memref<1x96xf32, #tpu.memory_space<vmem>>, %arg5: memref<1x8x32xbf16, #tpu.memory_space<vmem>>, %arg6: memref<1x8x32xbf16, #tpu.memory_space<vmem>>, %arg7: memref<1x8x32xbf16, #tpu.memory_space<vmem>>) attributes {dimension_semantics = [#tpu.dimension_semantics<parallel>, #tpu.dimension_semantics<parallel>], iteration_bounds = array<i64: 2, 1>, scalar_prefetch = 0 : i64, scratch_operands = 0 : i64, tpu.core_type = #tpu.core_type<tc>, window_params = [{transform_indices = @transform_0, window_bounds = array<i64: 1, 8, 32>}, {pipeline_mode = #tpu.pipeline_mode<synchronous>, transform_indices = @transform_1, window_bounds = array<i64: 32, 96>}, {pipeline_mode = #tpu.pipeline_mode<synchronous>, transform_indices = @transform_2, window_bounds = array<i64: 1, 96>}, {transform_indices = @transform_3, window_bounds = array<i64: 1, 8, 32>}, {transform_indices = @transform_4, window_bounds = array<i64: 1, 8, 32>}, {transform_indices = @transform_5, window_bounds = array<i64: 1, 8, 32>}]} {
    %c0 = arith.constant 0 : index
    %c0_0 = arith.constant 0 : index
    %c0_1 = arith.constant 0 : index
    %0 = vector.load %arg2[%c0, %c0_0, %c0_1] : memref<1x8x32xf32, #tpu.memory_space<vmem>>, vector<1x8x32xf32>
    %1 = vector.shape_cast %0 : vector<1x8x32xf32> to vector<8x32xf32>
    %2 = arith.truncf %1 : vector<8x32xf32> to vector<8x32xbf16>
    %c0_2 = arith.constant 0 : index
    %c0_3 = arith.constant 0 : index
    %3 = vector.load %arg3[%c0_2, %c0_3] : memref<32x96xbf16, #tpu.memory_space<vmem>>, vector<32x96xbf16>
    %cst = arith.constant dense<0.000000e+00> : vector<8x96xf32>
    %4 = tpu.matmul %2, %3, %cst {dimension_numbers = #tpu.dot_dimension_numbers<[1], [0], [0], [1], [0, 0, 1, 1], [], []>} : vector<8x32xbf16>, vector<32x96xbf16>, vector<8x96xf32> -> vector<8x96xf32>
    %c0_4 = arith.constant 0 : index
    %c0_5 = arith.constant 0 : index
    %5 = vector.load %arg4[%c0_4, %c0_5] : memref<1x96xf32, #tpu.memory_space<vmem>>, vector<1x96xf32>
    %6 = vector.broadcast %5 : vector<1x96xf32> to vector<8x96xf32>
    %7 = arith.addf %4, %6 : vector<8x96xf32>
    %8 = vector.extract_strided_slice %7 {offsets = [0, 0], sizes = [8, 32], strides = [1, 1]} : vector<8x96xf32> to vector<8x32xf32>
    %cst_6 = arith.constant 0.353553385 : f32
    %9 = vector.broadcast %cst_6 : f32 to vector<8x32xf32>
    %10 = arith.mulf %8, %9 : vector<8x32xf32>
    %11 = arith.truncf %10 : vector<8x32xf32> to vector<8x32xbf16>
    %c0_7 = arith.constant 0 : index
    %c0_8 = arith.constant 0 : index
    %c0_9 = arith.constant 0 : index
    %12 = vector.load %arg5[%c0_7, %c0_8, %c0_9] : memref<1x8x32xbf16, #tpu.memory_space<vmem>>, vector<1x8x32xbf16>
    %13 = vector.shape_cast %12 : vector<1x8x32xbf16> to vector<8x32xbf16>
    %14 = vector.shape_cast %11 : vector<8x32xbf16> to vector<1x8x32xbf16>
    tpu.vector_store %arg5[%c0_7, %c0_8, %c0_9], %14 {strides = array<i32>} : memref<1x8x32xbf16, #tpu.memory_space<vmem>>, vector<1x8x32xbf16>,
    %15 = vector.extract_strided_slice %7 {offsets = [0, 32], sizes = [8, 32], strides = [1, 1]} : vector<8x96xf32> to vector<8x32xf32>
    %16 = arith.truncf %15 : vector<8x32xf32> to vector<8x32xbf16>
    %c0_10 = arith.constant 0 : index
    %c0_11 = arith.constant 0 : index
    %c0_12 = arith.constant 0 : index
    %17 = vector.load %arg6[%c0_10, %c0_11, %c0_12] : memref<1x8x32xbf16, #tpu.memory_space<vmem>>, vector<1x8x32xbf16>
    %18 = vector.shape_cast %17 : vector<1x8x32xbf16> to vector<8x32xbf16>
    %19 = vector.shape_cast %16 : vector<8x32xbf16> to vector<1x8x32xbf16>
    tpu.vector_store %arg6[%c0_10, %c0_11, %c0_12], %19 {strides = array<i32>} : memref<1x8x32xbf16, #tpu.memory_space<vmem>>, vector<1x8x32xbf16>,
    %20 = vector.extract_strided_slice %7 {offsets = [0, 64], sizes = [8, 32], strides = [1, 1]} : vector<8x96xf32> to vector<8x32xf32>
    %21 = arith.truncf %20 : vector<8x32xf32> to vector<8x32xbf16>
    %c0_13 = arith.constant 0 : index
    %c0_14 = arith.constant 0 : index
    %c0_15 = arith.constant 0 : index
    %22 = vector.load %arg7[%c0_13, %c0_14, %c0_15] : memref<1x8x32xbf16, #tpu.memory_space<vmem>>, vector<1x8x32xbf16>
    %23 = vector.shape_cast %22 : vector<1x8x32xbf16> to vector<8x32xbf16>
    %24 = vector.shape_cast %21 : vector<8x32xbf16> to vector<1x8x32xbf16>
    tpu.vector_store %arg7[%c0_13, %c0_14, %c0_15], %24 {strides = array<i32>} : memref<1x8x32xbf16, #tpu.memory_space<vmem>>, vector<1x8x32xbf16>,
    return
  }
  func.func @transform_0(%arg0: i32, %arg1: i32) -> (i32, i32, i32) {
    %c0_i32 = arith.constant 0 : i32
    %c0_i32_0 = arith.constant 0 : i32
    return %arg0, %arg1, %c0_i32 : i32, i32, i32
  }
  func.func @transform_1(%arg0: i32, %arg1: i32) -> (i32, i32) {
    %c0_i32 = arith.constant 0 : i32
    %c0_i32_0 = arith.constant 0 : i32
    %c0_i32_1 = arith.constant 0 : i32
    return %c0_i32, %c0_i32_0 : i32, i32
  }
  func.func @transform_2(%arg0: i32, %arg1: i32) -> (i32, i32) {
    %c0_i32 = arith.constant 0 : i32
    %c0_i32_0 = arith.constant 0 : i32
    %c0_i32_1 = arith.constant 0 : i32
    return %c0_i32, %c0_i32_0 : i32, i32
  }
  func.func @transform_3(%arg0: i32, %arg1: i32) -> (i32, i32, i32) {
    %c0_i32 = arith.constant 0 : i32
    %c0_i32_0 = arith.constant 0 : i32
    return %arg0, %arg1, %c0_i32 : i32, i32, i32
  }
  func.func @transform_4(%arg0: i32, %arg1: i32) -> (i32, i32, i32) {
    %c0_i32 = arith.constant 0 : i32
    %c0_i32_0 = arith.constant 0 : i32
    return %arg0, %arg1, %c0_i32 : i32, i32, i32
  }
  func.func @transform_5(%arg0: i32, %arg1: i32) -> (i32, i32, i32) {
    %c0_i32 = arith.constant 0 : i32
    %c0_i32_0 = arith.constant 0 : i32
    return %arg0, %arg1, %c0_i32 : i32, i32, i32
  }
}

</mosaic_0001>

<bundles_post_ra>
// kernel: tpu_custom_call.1
= control target key start
LH: loop header
LB: loop body
LE: loop exit
PB: predicated region body
PF: predicated region fallthrough
CT: control target
= control target key end

     0   :  { %s1122_s0 = inlined_call_operand.hbm [shape: f32[2,8,32], index: 0, kind: input, shape index: {}]   ;;  %s1123_s1 = inlined_call_operand.hbm [shape: bf16[32,96], index: 1, kind: input, shape index: {}]   ;;  %s1124_s2 = inlined_call_operand.vmem [shape: f32[1,96], index: 2, kind: input, shape index: {}]   ;;  %s1125_s3 = inlined_call_operand.hbm [shape: bf16[2,8,32], index: 3, kind: output, shape index: {0}]   ;;  %s1126_s4 = inlined_call_operand.hbm [shape: bf16[2,8,32], index: 4, kind: output, shape index: {1}]   ;;  %s1127_s5 = inlined_call_operand.hbm [shape: bf16[2,8,32], index: 5, kind: output, shape index: {2}]  }
   0x1   :  { %1129 = sst [smem:[#allocation15_spill]] %s1122_s0 }
   0x2   :  { %11 = vsyncpa [#allocation3], 0 }
   0x3   :  { %13 = vsyncpa [#allocation3 + $0x1], 0 }
   0x4   :  { %14 = vsyncpa [#allocation6], 0 }
   0x5   :  { %15 = vsyncpa [#allocation4], 0 }
   0x6   :  { %17 = vsyncpa [#allocation4 + $0x1], 0 }
   0x7   :  { %18 = vsyncpa [#allocation9], 0 }
   0x8   :  { %20 = vsyncpa [#allocation9 + $0x1], 0  ;;  %s927_s18 = smov 0   ;;  %s929_s19 = smov 0  }
   0x9   :  { %s931_s20 = smov 0   ;;  %s933_s21 = smov 0  }
   0xa   :  { %s935_s22 = smov 0   ;;  %s937_s23 = smov 0  }
   0xb LB: > { %s958_s24 = sadd.s32 4294967295, %s890_s23   ;;  %p566_p0 = scmp.ge.s32.totalorder %s890_s23, 1  ;;  %s890_s23 = sphi %s937_s23, %s26_s23   ;;  %s886_s22 = sphi %s935_s22, %s1141_s22   ;;  %s882_s21 = sphi %s933_s21, %s1140_s21   ;;  %s878_s20 = sphi %s931_s20, %s1139_s20   ;;  %s874_s19 = sphi %s929_s19, %s1138_s19   ;;  %s870_s18 = sphi %s927_s18, %s1137_s18  }
   0xc   : > { %p61_p1 = scmp.eq.s32.totalorder %s958_s24, 0  ;;  %p197_p2 = scmp.lt.s32.totalorder %s890_s23, 3 }
   0xd   : > { %s208_s27 = sshll.u32 %s1123_s1, 4  ;;  %s892_s29 = smov [#allocation5]   ;;  %s209_s27 = int_to_ptr.hbm [resolvable:$true] %s208_s27 }
   0xe   : > { %p966_p3 = pnand %p566_p0, %p197_p2  ;;  %s210_s30 = sshll.u32 %s892_s29, 4  ;;  %s211_s30 = int_to_ptr.vmem [resolvable:$true] %s210_s30 }
   0xf   : > { %p568_p6 = scmp.ge.s32.totalorder %s890_s23, 2  ;;  %s893_s6 = smov 64  }
  0x10   : > { %p608_p4 = pneg %p966_p3  ;;  %s894_s7 = smov 4  }
  0x11   : > { %s1128_s8 = sadd.s32 4294967294, %s890_s23   ;;  %s38_s9 = sadd.s32 1, %s886_s22 }
  0x12   : > { %p609_p5 = pnand %p608_p4, %p61_p1  ;;  %s47_s10 = sadd.s32 1, %s878_s20 }
  0x13   : > { %p40_p7 = scmp.ge.s32.totalorder %s38_s9, 2  ;;  %p54_p8 = scmp.ne.s32.totalorder %s878_s20, %s874_s19 }
  0x14   : > { %611 = dma.hbm_to_vmem [thread:$0]  (!%p609_p5), %s209_s27, 256, %s211_s30, [#allocation6], %s893_s6, %s893_s6, %s894_s7  }
  0x15   : > { %p55_p9 = scmp.eq.s32.totalorder %s890_s23, 0  ;;  %p60_p10 = scmp.ne.s32.totalorder %s874_s19, %s870_s18 }
  0x16   : > { %s1143_s9 = smov (%p40_p7, %s38_s9), 0  ;;  %p128_p13 = scmp.eq.s32.totalorder %s958_s24, 1 }
  0x17   : > { %p985_p11 = por %p55_p9, %p54_p8  ;;  %p991_p12 = por %p61_p1, %p60_p10 }
  0x18   : > { %s42_s13 = ssub.s32 %s886_s22, %s1143_s9  ;;  %p134_p2 = scmp.eq.s32.totalorder %s1128_s8, 1 }
  0x19   : > { %p45_p0 = scmp.eq.s32.totalorder %s42_s13, 0  ;;  %p1000_p4 = por %p128_p13, %p54_p8 }
  0x1a   : > { %p627_p5 = scmp.lt.s32.totalorder %s890_s23, 2  ;;  %p1008_p7 = por %p134_p2, %p60_p10 }
  0x1b   : > { %s1006_s15 = scalar_select %p45_p0, %s878_s20, %s47_s10  }
  0x1c   : > { %s227_s17 = sand.u32 1, %s878_s20   ;;  %s570_s26 = sshll.u32 %s886_s22, 3 }
  0x1d   : > { %s569_s25 = sshll.u32 %s227_s17, 3  ;;  %s1135_s0 = sld [smem:[#allocation15_spill]] }
  0x1e   : > { %s231_s6 = scalar_lea.vmem [#allocation2], %s569_s25  ;;  %p613_p8 = pnand %p627_p5, %p985_p11 }
  0x1f   : > { %s240_s7 = sshll.u32 %s231_s6, 4  ;;  %s228_s10 = scalar_lea.sflag [#allocation3], %s227_s17  ;;  %s241_s7 = int_to_ptr.vmem [resolvable:$true] %s240_s7 }
  0x20   : > { %s1022_s8 = sand.u32 (!%p966_p3), 1, %s874_s19  }
  0x21   : > { %249 = sbr.rel (%p966_p3) target bundleno = 310 (0x136), region = 32  ;;  %s572_s27 = sshll.u32 (!%p966_p3), %s1022_s8, 3 }
  0x22   : > { %s255_s25 = scalar_lea.vmem (!%p966_p3), [#allocation2], %s572_s27 }
  0x23   : > { %s236_s30 = scalar_lea.hbm %s1135_s0, %s570_s26  ;;  %s252_s26 = scalar_lea.sflag (!%p966_p3), [#allocation3], %s1022_s8 }
  0x24   : > { %s238_s13 = sshll.u32 %s236_s30, 4  ;;  %s239_s13 = int_to_ptr.hbm [resolvable:$true] %s238_s13 }
  0x25   : > { %615 = dma.hbm_to_vmem [thread:$0]  (!%p613_p8), %s239_s13, 128, %s241_s7, %s228_s10  }
  0x26   : > { %853 = dma.done.wait (%p991_p12), %s252_s26, 128  }
  0x27   : > { %855 = vsyncadd (%p991_p12), %s252_s26, 4294967168 }
  0x28   : > { %857 = dma.done.wait (%p61_p1), [#allocation6], 256  }
  0x29   : > { %859 = vsyncadd (%p61_p1), [#allocation6], 4294967040  ;;  %v595_v0 = vld [vmem:[#allocation5 + $0x8] sm:$0xff]  ;;  %v594_v1 = vld [vmem:[#allocation5] sm:$0xff]  ;;  %vm321_vm0 = vcmask 261120   ;;  %s1038_s12 = sshll.u32 %s1022_s8, 2 }
  0x2a   : > { %331 = vmatpush.bf16.msra.mxu0 %v595_v0  ;;  %v299_v2 = vld [vmem:[%s255_s25] sm:$0xff]  ;;  %s1041_s17 = sshll.u32 %s882_s21, 2  ;;  %s283_s7 = scalar_lea.vmem [#allocation7], %s1038_s12  ;;  %vm340_vm1 = vcmask 257024  }
  0x2b   : > { %v300_v3 = vpack.c.bf16 %v299_v2, %v299_v2  ;;  %v683_v4 = vld [vmem:[%s1124_s2] ss:$0 sm:$0xff]  ;;  %s374_s6 = scalar_lea.hbm %s1125_s3, %s1041_s17  ;;  %s376_s13 = sshll.u32 %s283_s7, 4  ;;  %s377_s13 = int_to_ptr.vmem [resolvable:$true] %s376_s13 }
  0x2c   : > { %s378_s10 = sshll.u32 %s374_s6, 4  ;;  %s895_s27 = smov 96   ;;  %s379_s10 = int_to_ptr.hbm [resolvable:$true] %s378_s10 }
  0x2d   : > { %s353_s21 = scalar_lea.sflag [#allocation4], %s1022_s8  ;;  %s758_s26 = sshra.s32 %s379_s10, 4  ;;  %s759_s26 = int_to_ptr.hbm [resolvable:$true] %s758_s26 }
  0x2e   : > { %332 = vmatpush.bf16.msra.mxu0 %v594_v1  ;;  %s760_s25 = scalar_lea.hbm %s759_s26, 4  ;;  %s764_s29 = scalar_lea.hbm %s1125_s3, 8 }
  0x2f   : > { %p761_p1 = scmp.ne.s32.totalorder %s759_s26, %s760_s25  ;;  %p765_p10 = scmp.lt.s32.totalorder %s759_s26, %s1125_s3 }
  0x30   : > { %p766_p11 = scmp.lt.s32.totalorder %s764_s29, %s760_s25 }
  0x31   : > { %585 = vmatmul.msk.bf16.vlgmr.msra.gmra.mxu0 %vm321_vm0, %v300_v3  ;;  %p762_p3 = pnand %p761_p1, %p1000_p4 }
  0x32   : > { %p767_p12 = por %p766_p11, %p765_p10 }
  0x33   : > { %p763_p9 = pneg %p762_p3 }
  0x35   : > { %p768_p13 = pnand %p767_p12, %p763_p9 }
  0xae   : > { %v334_v5 = vpop.f32.mrf.mxu0 }
  0xaf   : > { %v335_v6 = vadd.f32 %v683_v4, %v334_v5 }
  0xb1   : > { %v338_v7 = vmul.f32 0.35355338, %v335_v6  ;;  %v342_v8 = vpack.c.bf16 %v335_v6, %v335_v6 }
  0xb3   : > { %v339_v9 = vpack.c.bf16 %v338_v7, %v338_v7  ;;  %344 = vrot.lane.b32.xlu0 %v342_v8, %s895_s27 }
  0xb5   : > { %341 = vst.msk [vmem:[%s283_s7] sm:$0xf] %vm340_vm1, %v339_v9 }
  0xb6   : > { %v336_v10 = vpop.f32.mrf.mxu0 }
  0xb7   : > { %771 = shalt.err (!%p768_p13)
}
  0xb8   : > { %602 = dma.vmem_to_hbm [thread:$0]  (%p1000_p4), %s377_s13, 64, %s379_s10, %s353_s21  }
  0xb9   : > { %s896_s8 = smov 64   ;;  %s389_s28 = scalar_lea.hbm %s1126_s4, %s1041_s17 }
  0xba   : > { %s357_s11 = sand.u32 1, %s958_s24   ;;  %s290_s26 = scalar_lea.vmem [#allocation8], %s1038_s12 }
  0xbb   : > { %348 = vrot.lane.b32.xlu0 %v342_v8, %s896_s8  ;;  %s391_s25 = sshll.u32 %s290_s26, 4  ;;  %s393_s29 = sshll.u32 %s389_s28, 4  ;;  %s392_s25 = int_to_ptr.vmem [resolvable:$true] %s391_s25  ;;  %s394_s29 = int_to_ptr.hbm [resolvable:$true] %s393_s29 }
  0xbc   : > { %s404_s13 = scalar_lea.hbm %s1127_s5, %s1041_s17  ;;  %s1071_s10 = scalar_lea.sflag [#allocation9], %s357_s11 }
  0xbd   : > { %s786_s21 = sshra.s32 %s394_s29, 4  ;;  %s792_s27 = scalar_lea.hbm %s1126_s4, 8  ;;  %s787_s21 = int_to_ptr.hbm [resolvable:$true] %s786_s21 }
  0xbe   : > { %s788_s8 = scalar_lea.hbm %s787_s21, 4  ;;  %p793_p8 = scmp.lt.s32.totalorder %s787_s21, %s1126_s4 }
  0xbf   : > { %p789_p0 = scmp.ne.s32.totalorder %s787_s21, %s788_s8  ;;  %p794_p1 = scmp.lt.s32.totalorder %s792_s27, %s788_s8 }
  0xc1   : > { %p790_p2 = pnand %p789_p0, %p1000_p4  ;;  %p795_p3 = por %p794_p1, %p793_p8 }
  0xc3   : > { %p791_p5 = pneg %p790_p2 }
  0xc5   : > { %p796_p9 = pnand %p795_p3, %p791_p5 }
 0x125   : > { %v345_v11 = vpop.permute.xlu0 %344 }
 0x126   : > { %347 = vst.msk [vmem:[%s290_s26] sm:$0xf] %vm340_vm1, %v345_v11 }
 0x127   : > { %799 = shalt.err (!%p796_p9)
}
 0x128   : > { %603 = dma.vmem_to_hbm [thread:$0]  (%p1000_p4), %s392_s25, 64, %s394_s29, %s1071_s10  }
 0x129   : > { %s297_s17 = scalar_lea.vmem [#allocation10], %s1038_s12  ;;  %s408_s26 = sshll.u32 %s404_s13, 4  ;;  %s409_s26 = int_to_ptr.hbm [resolvable:$true] %s408_s26 }
 0x12a   : > { %s406_s11 = sshll.u32 %s297_s17, 4  ;;  %s814_s0 = sshra.s32 %s409_s26, 4  ;;  %s407_s11 = int_to_ptr.vmem [resolvable:$true] %s406_s11  ;;  %s815_s0 = int_to_ptr.hbm [resolvable:$true] %s814_s0 }
 0x12b   : > { %s816_s30 = scalar_lea.hbm %s815_s0, 4  ;;  %s820_s8 = scalar_lea.hbm %s1127_s5, 8 }
 0x12c   : > { %p817_p10 = scmp.ne.s32.totalorder %s815_s0, %s816_s30  ;;  %p821_p13 = scmp.lt.s32.totalorder %s815_s0, %s1127_s5 }
 0x12d   : > { %v349_v12 = vpop.permute.xlu0 %348  ;;  %p822_p0 = scmp.lt.s32.totalorder %s820_s8, %s816_s30 }
 0x12e   : > { %351 = vst.msk [vmem:[%s297_s17] sm:$0xf] %vm340_vm1, %v349_v12  ;;  %p818_p11 = pnand %p817_p10, %p1000_p4 }
 0x12f   : > { %p823_p2 = por %p822_p0, %p821_p13 }
 0x130   : > { %p819_p12 = pneg %p818_p11 }
 0x132   : > { %p824_p5 = pnand %p823_p2, %p819_p12 }
 0x134   : > { %827 = shalt.err (!%p824_p5)
}
 0x135   : > { %604 = dma.vmem_to_hbm [thread:$0]  (%p1000_p4), %s407_s11, 64, %s409_s26, %s1071_s10  }
 0x136 PF: > { %s420_s29 = sand.u32 1, %s870_s18   ;;  %p617_p8 = pnand %p568_p6, %p1008_p7 }
 0x137   : > { %s421_s13 = scalar_lea.sflag [#allocation4], %s420_s29 }
 0x138   : > { %p618_p1 = pneg %p617_p8 }
 0x13a   : > { %861 = dma.done.wait (%p618_p1), %s421_s13, 64  }
 0x13b   : > { %863 = vsyncadd (%p618_p1), %s421_s13, 4294967232  ;;  %s1136_s24 = sadd.s32 4294967294, %s890_s23  }
 0x13c   : > { %s430_s7 = sand.u32 1, %s1136_s24  }
 0x13d   : > { %s431_s27 = scalar_lea.sflag [#allocation9], %s430_s7 }
 0x13e   : > { %865 = dma.done.wait (%p618_p1), %s431_s27, 128  }
 0x13f   : > { %867 = vsyncadd (%p618_p1), %s431_s27, 4294967168  ;;  %s26_s23 = sadd.s32 1, %s890_s23   ;;  %s1137_s18 = smov %s874_s19 }
 0x140   : > { %p23_p4 = scmp.ge.s32.totalorder %s26_s23, 4   ;;  %s1138_s19 = smov %s878_s20 }
 0x141   : > { %s1139_s20 = smov %s1006_s15  ;;  %s1140_s21 = smov %s886_s22 }
 0x142   : > { %s1141_s22 = smov %s1143_s9  ;;  %25 = sbr.rel (!%p23_p4) target bundleno = 11 (0xb), region = 113 }
 0x147   :  { %447 = vsyncpa [#allocation3], 1 }
 0x148   :  { %449 = vsyncpa [#allocation3 + $0x1], 1 }
 0x149   :  { %450 = vsyncpa [#allocation6], 1 }
 0x14a   :  { %451 = vsyncpa [#allocation4], 1 }
 0x14b   :  { %453 = vsyncpa [#allocation4 + $0x1], 1 }
 0x14c   :  { %454 = vsyncpa [#allocation9], 1 }
 0x14d   :  { %456 = vsyncpa [#allocation9 + $0x1], 1 }

</bundles_post_ra>
